<compile_context>
chip_gen: v6e
topology: v6e:2x2x1
jax: 0.10.0
libtpu: 0.0.40
codegen_flags: <defaults>
</compile_context>

<pallas_src>
import functools

import numpy as np
import jax
import jax.numpy as jnp
from jax import lax
from jax.experimental import pallas as pl
from jax.experimental.pallas import tpu as pltpu


# ----------------------------------------------------------------------------
# position encoding (glue, exact reproduction of the numpy reference)
# ----------------------------------------------------------------------------
def position_encoding_init(n_position, d_pos_vec):
    position_enc = np.array(
        [[pos / np.power(10000, 2 * (j // 2) / d_pos_vec) for j in range(d_pos_vec)]
         if pos != 0 else np.zeros(d_pos_vec)
         for pos in range(n_position)])
    position_enc[1:, 0::2] = np.sin(position_enc[1:, 0::2])
    position_enc[1:, 1::2] = np.cos(position_enc[1:, 1::2])
    return jnp.asarray(position_enc, dtype=jnp.float32)


# ----------------------------------------------------------------------------
# Pallas kernel: one grid step == `block_batch` batch elements, fully batched
# ----------------------------------------------------------------------------
def _selfatt_kernel(x_ref, w_ref, posb_ref, gamma_ref, beta_ref,
                    selfatt_ref, ctx_ref, *,
                    seq_len, dhid, block_batch, inv_sqrt_dk, inv_seq):
    # x_ref:       (block_batch*S, din)   raw input rows (no pos concat in HBM)
    # w_ref:       (din, 3*dhid)          fused [Wq | Wk | Wv] (input half)
    # posb_ref:    (S, 3*dhid)            pos @ W[din:] + [bq|bk|bv]  (batch-invariant)
    # selfatt_ref: (block_batch*S, dhid)
    # ctx_ref:     (block_batch, dhid)
    mblk = block_batch * seq_len

    # Single fused Q/K/V projection for all rows of this step (tall M, 3*dhid
    # output lanes).  The batch-invariant positional part + bias is the tiny
    # precomputed posb constant, broadcast-added (no tiling in HBM/VMEM).
    qkv2d = jnp.dot(x_ref[...], w_ref[...],
                    preferred_element_type=jnp.float32)            # (mblk, 3*dhid)
    # S == 8 rows == exactly one sublane tile, so this reshape is layout-free.
    qkv = qkv2d.reshape(block_batch, seq_len, 3 * dhid) + posb_ref[...][None]

    # Slice q/k/v once per step on the full slab (not per batch element).
    q = qkv[:, :, 0 * dhid:1 * dhid]
    k = qkv[:, :, 1 * dhid:2 * dhid]
    v = qkv[:, :, 2 * dhid:3 * dhid]

    # scores[b, i, j] = q_i . k_j   (batched, contracting last dims; no k.T)
    scores = jnp.einsum('bqd,bkd->bqk', q, k,
                        preferred_element_type=jnp.float32)        # (B, S, S)

    # F.softmax(dim=1) on (B, S, S) == softmax over the *query* index (axis 1);
    # the reference divides by sqrt(dk) AFTER the softmax.  Fold the constant
    # scale into the per-column reciprocal so the (B,S,S)-sized divide becomes
    # a single multiply.
    m = jnp.max(scores, axis=1, keepdims=True)
    e = jnp.exp(scores - m)
    r = inv_sqrt_dk * pl.reciprocal(jnp.sum(e, axis=1, keepdims=True),
                                    approx=False)                  # (B, 1, S)
    attn = e * r

    selfatt = jnp.einsum('bqk,bkd->bqd', attn, v,
                         preferred_element_type=jnp.float32)       # (B, S, dhid)

    # Whole-slab store (merging leading dims is layout-free).
    selfatt_ref[...] = selfatt.reshape(mblk, dhid)

    # LayerNorm over the last dim (PyTorch default eps=1e-5, biased var),
    # then context = LN(selfatt).sum(dim=1) / seq_len; single slab store.
    mean = jnp.mean(selfatt, axis=-1, keepdims=True)
    var = jnp.mean((selfatt - mean) ** 2, axis=-1, keepdims=True)
    ln = ((selfatt - mean) * lax.rsqrt(var + 1e-5)
          * gamma_ref[...][None] + beta_ref[...][None])
    ctx_ref[...] = jnp.sum(ln, axis=1) * inv_seq


# ----------------------------------------------------------------------------
# block_batch policy: biggest slab that fits the VMEM budget
# ----------------------------------------------------------------------------
def _per_step_bytes(bb, seq_len, din, dhid):
    """Approximate per-grid-step VMEM footprint (f32, double-buffered I/O)."""
    mblk = bb * seq_len
    io = mblk * din + mblk * dhid + bb * dhid                     # x, selfatt, ctx
    resident = din * 3 * dhid + seq_len * 3 * dhid + 2 * dhid     # W, posb, gamma/beta
    interm = mblk * 3 * dhid + bb * seq_len * seq_len + 2 * mblk * dhid
    return 4 * (2 * io + 2 * resident + interm)


def _choose_block_batch(batch, seq_len, din, dhid, budget_bytes):
    # Whole batch in one step when it fits (v5e/v6e: single TC, extra grid
    # steps are pure ~0.35us overhead at microsecond scale).
    if _per_step_bytes(batch, seq_len, din, dhid) <= budget_bytes:
        return batch
    # Otherwise: largest multiple of 8 under the budget (sublane-aligned ctx
    # block; safe vs. v7x's 64 MiB VMEM / default scoped limits).
    bb = 8
    while bb + 8 <= batch and _per_step_bytes(bb + 8, seq_len, din, dhid) <= budget_bytes:
        bb += 8
    return bb


# ----------------------------------------------------------------------------
# Python wrapper
# ----------------------------------------------------------------------------
def self_attention_transformer_v3(inp, params, *, block_batch=None,
                                  vmem_budget_bytes=24 << 20):
    """inp: (B, S, din) float32.

    Returns (input_selfatt (B, S, dhid), context (B, dhid)), matching
    SelfAttention_transformer_v3.forward.
    """
    batch, seq_len, din = inp.shape
    dhid = params["wq"].shape[1]

    if block_batch is None:
        block_batch = _choose_block_batch(batch, seq_len, din, dhid, vmem_budget_bytes)
    n_steps = pl.cdiv(batch, block_batch)
    bpad = n_steps * block_batch
    mblk = block_batch * seq_len

    # --- batch-invariant positional projection (precomputed once, NOT tiled)
    pos = position_encoding_init(seq_len, din)                                    # (S, din)
    w_all = jnp.concatenate([params["wq"], params["wk"], params["wv"]], axis=1)   # (2*din, 3*dhid)
    b_all = jnp.concatenate([params["bq"], params["bk"], params["bv"]])           # (3*dhid,)
    w_top = w_all[:din]                                                           # (din, 3*dhid)
    posb = pos @ w_all[din:] + b_all                                              # (S, 3*dhid)

    gamma = params["gamma"].reshape(1, dhid)
    beta = params["beta"].reshape(1, dhid)

    # --- fold batch into the matmul M dimension (wrapper-side reshape) ----
    x = inp
    if bpad != batch:
        x = jnp.pad(x, ((0, bpad - batch), (0, 0), (0, 0)))
    x2d = x.reshape(bpad * seq_len, din)

    kernel = functools.partial(
        _selfatt_kernel,
        seq_len=seq_len, dhid=dhid, block_batch=block_batch,
        inv_sqrt_dk=float(1.0 / np.sqrt(dhid)), inv_seq=float(1.0 / seq_len))

    # Raise the scoped-VMEM limit only when the footprint actually needs it
    # (v5e defaults to 16 MiB scoped; v7x physical VMEM is 64 MiB).
    est = _per_step_bytes(block_batch, seq_len, din, dhid)
    vmem_limit = None if est < (12 << 20) else min(est + est // 4, 48 << 20)

    selfatt2d, context = pl.pallas_call(
        kernel,
        grid=(n_steps,),
        in_specs=[
            pl.BlockSpec((mblk, din), lambda i: (i, 0)),          # input rows
            pl.BlockSpec((din, 3 * dhid), lambda i: (0, 0)),      # fused W (input half)
            pl.BlockSpec((seq_len, 3 * dhid), lambda i: (0, 0)),  # posb (batch-invariant)
            pl.BlockSpec((1, dhid), lambda i: (0, 0)),            # gamma
            pl.BlockSpec((1, dhid), lambda i: (0, 0)),            # beta
        ],
        out_specs=[
            pl.BlockSpec((mblk, dhid), lambda i: (i, 0)),         # selfatt rows
            pl.BlockSpec((block_batch, dhid), lambda i: (i, 0)),  # context rows
        ],
        out_shape=(
            jax.ShapeDtypeStruct((bpad * seq_len, dhid), jnp.float32),
            jax.ShapeDtypeStruct((bpad, dhid), jnp.float32),
        ),
        compiler_params=pltpu.CompilerParams(
            dimension_semantics=("parallel",),
            vmem_limit_bytes=vmem_limit),
    )(x2d, w_top, posb, gamma, beta)

    selfatt = selfatt2d.reshape(bpad, seq_len, dhid)[:batch]
    context = context[:batch]
    return selfatt, context


# ----------------------------------------------------------------------------
# pure-JAX reference (mirrors the original module, unfused)
# ----------------------------------------------------------------------------
def _reference(inp, params):
    batch, seq_len, d_feat = inp.shape
    dhid = params["wq"].shape[1]
    pos = position_encoding_init(seq_len, d_feat)
    x = jnp.concatenate([inp, jnp.broadcast_to(pos[None], inp.shape)], axis=2)
    q = x @ params["wq"] + params["bq"]
    k = x @ params["wk"] + params["bk"]
    v = x @ params["wv"] + params["bv"]
    scores = jnp.einsum("bid,bjd->bij", q, k)
    attn = jax.nn.softmax(scores, axis=1) / jnp.sqrt(jnp.float32(dhid))
    selfatt = jnp.einsum("bij,bjd->bid", attn, v)
    mean = selfatt.mean(-1, keepdims=True)
    var = ((selfatt - mean) ** 2).mean(-1, keepdims=True)
    ln = (selfatt - mean) / jnp.sqrt(var + 1e-5) * params["gamma"] + params["beta"]
    ctx = ln.sum(axis=1) / seq_len
    return selfatt, ctx


# ----------------------------------------------------------------------------
if __name__ == "__main__":
    batch, seq_len, din, dhid = 2, 8, 16, 32

    key = jax.random.PRNGKey(0)
    k_inp, k_wq, k_bq, k_wk, k_bk, k_wv, k_bv = jax.random.split(key, 7)

    inp = jax.random.normal(k_inp, (batch, seq_len, din), dtype=jnp.float32)

    lim = 1.0 / np.sqrt(2 * din)
    params = {
        "wq": jax.random.uniform(k_wq, (2 * din, dhid), jnp.float32, -lim, lim),
        "bq": jax.random.uniform(k_bq, (dhid,), jnp.float32, -lim, lim),
        "wk": jax.random.uniform(k_wk, (2 * din, dhid), jnp.float32, -lim, lim),
        "bk": jax.random.uniform(k_bk, (dhid,), jnp.float32, -lim, lim),
        "wv": jax.random.uniform(k_wv, (2 * din, dhid), jnp.float32, -lim, lim),
        "bv": jax.random.uniform(k_bv, (dhid,), jnp.float32, -lim, lim),
        "gamma": jnp.ones((dhid,), jnp.float32),   # nn.LayerNorm default init
        "beta": jnp.zeros((dhid,), jnp.float32),
    }

    selfatt, context = self_attention_transformer_v3(inp, params)
    jax.block_until_ready((selfatt, context))

    ref_selfatt, ref_context = _reference(inp, params)
    # Tolerance loosened slightly vs f32 machine eps: the split (input +
    # positional) projection reassociates the f32 dot-product sums.
    assert np.allclose(np.asarray(selfatt), np.asarray(ref_selfatt), atol=1e-4, rtol=1e-4)
    assert np.allclose(np.asarray(context), np.asarray(ref_context), atol=1e-4, rtol=1e-4)

    print("KERNEL_OK")
</pallas_src>

<mosaic_0001>
module attributes {stable_mosaic.version = 11 : i64} {
  func.func @_selfatt_kernel(%arg0: i32, %arg1: memref<16x16xf32, #tpu.memory_space<vmem>>, %arg2: memref<16x96xf32, #tpu.memory_space<vmem>>, %arg3: memref<8x96xf32, #tpu.memory_space<vmem>>, %arg4: memref<1x32xf32, #tpu.memory_space<vmem>>, %arg5: memref<1x32xf32, #tpu.memory_space<vmem>>, %arg6: memref<16x32xf32, #tpu.memory_space<vmem>>, %arg7: memref<2x32xf32, #tpu.memory_space<vmem>>) attributes {dimension_semantics = [#tpu.dimension_semantics<parallel>], iteration_bounds = array<i64: 1>, scalar_prefetch = 0 : i64, scratch_operands = 0 : i64, tpu.core_type = #tpu.core_type<tc>, window_params = [{transform_indices = @transform_0, window_bounds = array<i64: 16, 16>}, {pipeline_mode = #tpu.pipeline_mode<synchronous>, transform_indices = @transform_1, window_bounds = array<i64: 16, 96>}, {pipeline_mode = #tpu.pipeline_mode<synchronous>, transform_indices = @transform_2, window_bounds = array<i64: 8, 96>}, {pipeline_mode = #tpu.pipeline_mode<synchronous>, transform_indices = @transform_3, window_bounds = array<i64: 1, 32>}, {pipeline_mode = #tpu.pipeline_mode<synchronous>, transform_indices = @transform_4, window_bounds = array<i64: 1, 32>}, {transform_indices = @transform_5, window_bounds = array<i64: 16, 32>}, {transform_indices = @transform_6, window_bounds = array<i64: 2, 32>}]} {
    %c0 = arith.constant 0 : index
    %c0_0 = arith.constant 0 : index
    %0 = vector.load %arg1[%c0, %c0_0] : memref<16x16xf32, #tpu.memory_space<vmem>>, vector<16x16xf32>
    %c0_1 = arith.constant 0 : index
    %c0_2 = arith.constant 0 : index
    %1 = vector.load %arg2[%c0_1, %c0_2] : memref<16x96xf32, #tpu.memory_space<vmem>>, vector<16x96xf32>
    %cst = arith.constant dense<0.000000e+00> : vector<16x96xf32>
    %2 = tpu.matmul %0, %1, %cst {dimension_numbers = #tpu.dot_dimension_numbers<[1], [0], [0], [1], [0, 0, 1, 1], [], []>} : vector<16x16xf32>, vector<16x96xf32>, vector<16x96xf32> -> vector<16x96xf32>
    %3 = vector.shape_cast %2 : vector<16x96xf32> to vector<2x8x96xf32>
    %c0_3 = arith.constant 0 : index
    %c0_4 = arith.constant 0 : index
    %4 = vector.load %arg3[%c0_3, %c0_4] : memref<8x96xf32, #tpu.memory_space<vmem>>, vector<8x96xf32>
    %5 = vector.shape_cast %4 : vector<8x96xf32> to vector<1x8x96xf32>
    %6 = vector.broadcast %5 : vector<1x8x96xf32> to vector<2x8x96xf32>
    %7 = arith.addf %3, %6 : vector<2x8x96xf32>
    %8 = vector.extract_strided_slice %7 {offsets = [0, 0, 0], sizes = [2, 8, 32], strides = [1, 1, 1]} : vector<2x8x96xf32> to vector<2x8x32xf32>
    %9 = vector.extract_strided_slice %7 {offsets = [0, 0, 32], sizes = [2, 8, 32], strides = [1, 1, 1]} : vector<2x8x96xf32> to vector<2x8x32xf32>
    %10 = vector.extract_strided_slice %7 {offsets = [0, 0, 64], sizes = [2, 8, 32], strides = [1, 1, 1]} : vector<2x8x96xf32> to vector<2x8x32xf32>
    "tpu.trace_start"() <{level = 10 : i32, message = "bqd,bkd->bqk"}> : () -> ()
    %cst_5 = arith.constant dense<0.000000e+00> : vector<2x8x8xf32>
    %11 = tpu.matmul %8, %9, %cst_5 {dimension_numbers = #tpu.dot_dimension_numbers<[2], [2], [1], [1], [0, 0, 0, 1, 1, 1], [0], [0]>} : vector<2x8x32xf32>, vector<2x8x32xf32>, vector<2x8x8xf32> -> vector<2x8x8xf32>
    "tpu.trace_stop"() : () -> ()
    %cst_6 = arith.constant dense<0xFF800000> : vector<2x8xf32>
    %12 = vector.multi_reduction <maximumf>, %11, %cst_6 [1] : vector<2x8x8xf32> to vector<2x8xf32>
    %13 = vector.shape_cast %12 : vector<2x8xf32> to vector<2x1x8xf32>
    %14 = vector.broadcast %13 : vector<2x1x8xf32> to vector<2x8x8xf32>
    %15 = arith.subf %11, %14 : vector<2x8x8xf32>
    %16 = math.exp %15 : vector<2x8x8xf32>
    %cst_7 = arith.constant dense<0.000000e+00> : vector<2x8xf32>
    %17 = vector.multi_reduction <add>, %16, %cst_7 [1] : vector<2x8x8xf32> to vector<2x8xf32>
    %18 = vector.shape_cast %17 : vector<2x8xf32> to vector<2x1x8xf32>
    %19 = tpu.reciprocal %18 : vector<2x1x8xf32> -> vector<2x1x8xf32>
    %cst_8 = arith.constant 0.176776692 : f32
    %20 = vector.broadcast %cst_8 : f32 to vector<2x1x8xf32>
    %21 = arith.mulf %20, %19 : vector<2x1x8xf32>
    %22 = vector.broadcast %21 : vector<2x1x8xf32> to vector<2x8x8xf32>
    %23 = arith.mulf %16, %22 : vector<2x8x8xf32>
    "tpu.trace_start"() <{level = 10 : i32, message = "bqk,bkd->bqd"}> : () -> ()
    %cst_9 = arith.constant dense<0.000000e+00> : vector<2x8x32xf32>
    %24 = tpu.matmul %23, %10, %cst_9 {dimension_numbers = #tpu.dot_dimension_numbers<[2], [1], [1], [2], [0, 0, 0, 1, 1, 2], [0], [0]>} : vector<2x8x8xf32>, vector<2x8x32xf32>, vector<2x8x32xf32> -> vector<2x8x32xf32>
    "tpu.trace_stop"() : () -> ()
    %25 = vector.shape_cast %24 : vector<2x8x32xf32> to vector<16x32xf32>
    %c0_10 = arith.constant 0 : index
    %c0_11 = arith.constant 0 : index
    %26 = vector.load %arg6[%c0_10, %c0_11] : memref<16x32xf32, #tpu.memory_space<vmem>>, vector<16x32xf32>
    tpu.vector_store %arg6[%c0_10, %c0_11], %25 {strides = array<i32>} : memref<16x32xf32, #tpu.memory_space<vmem>>, vector<16x32xf32>,
    %cst_12 = arith.constant dense<0.000000e+00> : vector<2x8xf32>
    %27 = vector.multi_reduction <add>, %24, %cst_12 [2] : vector<2x8x32xf32> to vector<2x8xf32>
    %28 = vector.shape_cast %27 : vector<2x8xf32> to vector<2x8x1xf32>
    %cst_13 = arith.constant 3.200000e+01 : f32
    %29 = vector.broadcast %cst_13 : f32 to vector<2x8x1xf32>
    %30 = arith.divf %28, %29 : vector<2x8x1xf32>
    %31 = vector.broadcast %30 : vector<2x8x1xf32> to vector<2x8x32xf32>
    %32 = arith.subf %24, %31 : vector<2x8x32xf32>
    %33 = arith.mulf %32, %32 : vector<2x8x32xf32>
    %cst_14 = arith.constant dense<0.000000e+00> : vector<2x8xf32>
    %34 = vector.multi_reduction <add>, %33, %cst_14 [2] : vector<2x8x32xf32> to vector<2x8xf32>
    %35 = vector.shape_cast %34 : vector<2x8xf32> to vector<2x8x1xf32>
    %cst_15 = arith.constant 3.200000e+01 : f32
    %36 = vector.broadcast %cst_15 : f32 to vector<2x8x1xf32>
    %37 = arith.divf %35, %36 : vector<2x8x1xf32>
    %38 = vector.broadcast %30 : vector<2x8x1xf32> to vector<2x8x32xf32>
    %39 = arith.subf %24, %38 : vector<2x8x32xf32>
    %cst_16 = arith.constant 9.99999974E-6 : f32
    %40 = vector.broadcast %cst_16 : f32 to vector<2x8x1xf32>
    %41 = arith.addf %37, %40 : vector<2x8x1xf32>
    %42 = math.rsqrt %41 : vector<2x8x1xf32>
    %43 = vector.broadcast %42 : vector<2x8x1xf32> to vector<2x8x32xf32>
    %44 = arith.mulf %39, %43 : vector<2x8x32xf32>
    %c0_17 = arith.constant 0 : index
    %c0_18 = arith.constant 0 : index
    %45 = vector.load %arg4[%c0_17, %c0_18] : memref<1x32xf32, #tpu.memory_space<vmem>>, vector<1x32xf32>
    %46 = vector.shape_cast %45 : vector<1x32xf32> to vector<1x1x32xf32>
    %47 = vector.broadcast %46 : vector<1x1x32xf32> to vector<2x8x32xf32>
    %48 = arith.mulf %44, %47 : vector<2x8x32xf32>
    %c0_19 = arith.constant 0 : index
    %c0_20 = arith.constant 0 : index
    %49 = vector.load %arg5[%c0_19, %c0_20] : memref<1x32xf32, #tpu.memory_space<vmem>>, vector<1x32xf32>
    %50 = vector.shape_cast %49 : vector<1x32xf32> to vector<1x1x32xf32>
    %51 = vector.broadcast %50 : vector<1x1x32xf32> to vector<2x8x32xf32>
    %52 = arith.addf %48, %51 : vector<2x8x32xf32>
    %cst_21 = arith.constant dense<0.000000e+00> : vector<2x32xf32>
    %53 = vector.multi_reduction <add>, %52, %cst_21 [1] : vector<2x8x32xf32> to vector<2x32xf32>
    %cst_22 = arith.constant 1.250000e-01 : f32
    %54 = vector.broadcast %cst_22 : f32 to vector<2x32xf32>
    %55 = arith.mulf %53, %54 : vector<2x32xf32>
    %c0_23 = arith.constant 0 : index
    %c0_24 = arith.constant 0 : index
    %56 = vector.load %arg7[%c0_23, %c0_24] : memref<2x32xf32, #tpu.memory_space<vmem>>, vector<2x32xf32>
    tpu.vector_store %arg7[%c0_23, %c0_24], %55 {strides = array<i32>} : memref<2x32xf32, #tpu.memory_space<vmem>>, vector<2x32xf32>,
    return
  }
  func.func @transform_0(%arg0: i32) -> (i32, i32) {
    %c0_i32 = arith.constant 0 : i32
    %c0_i32_0 = arith.constant 0 : i32
    return %arg0, %c0_i32 : i32, i32
  }
  func.func @transform_1(%arg0: i32) -> (i32, i32) {
    %c0_i32 = arith.constant 0 : i32
    %c0_i32_0 = arith.constant 0 : i32
    %c0_i32_1 = arith.constant 0 : i32
    return %c0_i32, %c0_i32_0 : i32, i32
  }
  func.func @transform_2(%arg0: i32) -> (i32, i32) {
    %c0_i32 = arith.constant 0 : i32
    %c0_i32_0 = arith.constant 0 : i32
    %c0_i32_1 = arith.constant 0 : i32
    return %c0_i32, %c0_i32_0 : i32, i32
  }
  func.func @transform_3(%arg0: i32) -> (i32, i32) {
    %c0_i32 = arith.constant 0 : i32
    %c0_i32_0 = arith.constant 0 : i32
    %c0_i32_1 = arith.constant 0 : i32
    return %c0_i32, %c0_i32_0 : i32, i32
  }
  func.func @transform_4(%arg0: i32) -> (i32, i32) {
    %c0_i32 = arith.constant 0 : i32
    %c0_i32_0 = arith.constant 0 : i32
    %c0_i32_1 = arith.constant 0 : i32
    return %c0_i32, %c0_i32_0 : i32, i32
  }
  func.func @transform_5(%arg0: i32) -> (i32, i32) {
    %c0_i32 = arith.constant 0 : i32
    %c0_i32_0 = arith.constant 0 : i32
    return %arg0, %c0_i32 : i32, i32
  }
  func.func @transform_6(%arg0: i32) -> (i32, i32) {
    %c0_i32 = arith.constant 0 : i32
    %c0_i32_0 = arith.constant 0 : i32
    return %arg0, %c0_i32 : i32, i32
  }
}

</mosaic_0001>

<bundles_post_ra>
// kernel: tpu_custom_call.1
= control target key start
LH: loop header
LB: loop body
LE: loop exit
PB: predicated region body
PF: predicated region fallthrough
CT: control target
= control target key end

     0   :  { %12 = vsyncpa [#allocation3], 0  ;;  %s880_s0 = inlined_call_operand.hbm [shape: f32[16,16], index: 0, kind: input, shape index: {}]   ;;  %s881_s1 = inlined_call_operand.hbm [shape: f32[16,96], index: 1, kind: input, shape index: {}]   ;;  %s882_s2 = inlined_call_operand.hbm [shape: f32[8,96], index: 2, kind: input, shape index: {}]   ;;  %s883_s3 = inlined_call_operand.vmem [shape: f32[1,32], index: 3, kind: input, shape index: {}]   ;;  %s884_s4 = inlined_call_operand.vmem [shape: f32[1,32], index: 4, kind: input, shape index: {}]   ;;  %s885_s5 = inlined_call_operand.hbm [shape: f32[16,32], index: 5, kind: output, shape index: {0}]   ;;  %s886_s6 = inlined_call_operand.hbm [shape: f32[2,32], index: 6, kind: output, shape index: {1}]  }
   0x1   :  { %13 = vsyncpa [#allocation6], 0 }
   0x2   :  { %14 = vsyncpa [#allocation4], 0 }
   0x3   :  { %15 = vsyncpa [#allocation10], 0  ;;  %s782_s21 = smov [#allocation5]   ;;  %s783_s23 = smov [#allocation2]  }
   0x4   :  { %s33_s22 = sshll.u32 %s782_s21, 4  ;;  %s21_s24 = sshll.u32 %s783_s23, 4  ;;  %s34_s22 = int_to_ptr.vmem [resolvable:$true] %s33_s22  ;;  %s22_s24 = int_to_ptr.vmem [resolvable:$true] %s21_s24 }
   0x5   :  { %s682_s25 = scalar_lea.vmem %s34_s22, 256  ;;  %p687_p1 = scmp.lt.s32.totalorder %s34_s22, %s34_s22 }
   0x6   :  { %p683_p0 = scmp.ne.s32.totalorder %s34_s22, %s682_s25  ;;  %p688_p2 = scmp.lt.s32.totalorder %s682_s25, %s682_s25 }
   0x8   :  { %p689_p3 = por %p688_p2, %p687_p1 }
   0xa   :  { %p690_p4 = pnand %p689_p3, %p683_p0 }
   0xc   :  { %693 = shalt.err (!%p690_p4)
}
   0xd   :  { %s784_s26 = smov 128   ;;  %s785_s27 = smov 8  }
   0xe   :  { %39 = dma.hbm_to_vmem [thread:$0]  %s881_s1, 256, %s34_s22, [#allocation6], %s784_s26, %s784_s26, %s785_s27  }
   0xf   :  { %s702_s30 = scalar_lea.vmem %s22_s24, 256  ;;  %p707_p6 = scmp.lt.s32.totalorder %s22_s24, %s22_s24 }
  0x10   :  { %p703_p5 = scmp.ne.s32.totalorder %s22_s24, %s702_s30  ;;  %p708_p7 = scmp.lt.s32.totalorder %s702_s30, %s702_s30 }
  0x12   :  { %p709_p8 = por %p708_p7, %p707_p6 }
  0x14   :  { %p710_p9 = pnand %p709_p8, %p703_p5 }
  0x16   :  { %713 = shalt.err (!%p710_p9)
}
  0x17   :  { %27 = dma.hbm_to_vmem [thread:$0]  %s880_s0, 256, %s22_s24, [#allocation3], %s784_s26, %s784_s26, %s785_s27  }
  0x18   :  { %s786_s9 = smov [#allocation7]  }
  0x19   :  { %s46_s10 = sshll.u32 %s786_s9, 4  ;;  %s47_s10 = int_to_ptr.vmem [resolvable:$true] %s46_s10 }
  0x1a   :  { %s722_s11 = scalar_lea.vmem %s47_s10, 128  ;;  %p727_p11 = scmp.lt.s32.totalorder %s47_s10, %s47_s10 }
  0x1b   :  { %p723_p10 = scmp.ne.s32.totalorder %s47_s10, %s722_s11  ;;  %p728_p12 = scmp.lt.s32.totalorder %s722_s11, %s722_s11 }
  0x1d   :  { %p729_p13 = por %p728_p12, %p727_p11 }
  0x1f   :  { %p730_p0 = pnand %p729_p13, %p723_p10 }
  0x21   :  { %733 = shalt.err (!%p730_p0)
}
  0x22   :  { %49 = dma.hbm_to_vmem [thread:$0]  %s882_s2, 128, %s47_s10, [#allocation6]  }
  0x23   :  { %774 = dma.done.wait [#allocation3], 256  }
  0x24   :  { %775 = vsyncadd [#allocation3], 4294967040 }
  0x25   :  { %776 = dma.done.wait [#allocation6], 384  }
  0x26   :  { %777 = vsyncadd [#allocation6], 4294966912  ;;  %vm67_vm0 = vcmask 130048   ;;  %v66_v0 = vld [vmem:[#allocation5 + $0x8] sm:$0xff]  ;;  %v65_v1 = vld [vmem:[#allocation5] sm:$0xff]  ;;  %v787_v4 = vmov 0.0  }
  0x27   :  { %v63_v2 = vld [vmem:[#allocation2] sm:$0xff]  ;;  %624 = vmatprep.subr.mxu0 %v66_v0  ;;  %v64_v3 = vld [vmem:[#allocation2 + $0x8] sm:$0xff]  ;;  %631 = vmatprep.subr.mxu1 %v787_v4  ;;  %vm788_vm1 = vmmov 0   ;;  %s789_s0 = smov 64   ;;  %s790_s2 = smov 96   ;;  %vm155_vm2 = vcmask 261120  }
  0x28   :  { %628 = vmatprep.mubr.msk.f32.mxu0 %vm67_vm0, %v63_v2  ;;  %625 = vmatpush3.msra.mxu0 %v66_v0  ;;  %v149_v6 = vld [vmem:[#allocation7] sm:$0xff]  ;;  %vm307_vm3 = vcmask 64512   ;;  %s791_s13 = smov [#allocation8]  }
  0x29   :  { %626 = vmatprep.subr.mxu0 %v65_v1  ;;  %633 = vmatprep.mubr.msk.f32.mxu1 %vm788_vm1, %v787_v4  ;;  %s575_s14 = sshll.u32 %s791_s13, 4  ;;  %s576_s14 = int_to_ptr.vmem [resolvable:$true] %s575_s14 }
  0x2a   :  { %627 = vmatpush3.msra.mxu0 %v65_v1  ;;  %s734_s15 = scalar_lea.vmem %s576_s14, 256  ;;  %p739_p2 = scmp.lt.s32.totalorder %s576_s14, %s576_s14 }
  0x2b   :  { %629 = vmatmul.mubr.msk.f32.vlgmr.msra.gmra.mxu0 %vm67_vm0, %v64_v3  ;;  %636 = vmatprep.subr.mxu0 %v787_v4  ;;  %p735_p1 = scmp.ne.s32.totalorder %s576_s14, %s734_s15  ;;  %p740_p3 = scmp.lt.s32.totalorder %s734_s15, %s734_s15 }
  0x2c   :  { %638 = vmatprep.mubr.msk.f32.mxu0 %vm788_vm1, %v787_v4 }
  0x2d   :  { %p741_p4 = por %p740_p3, %p739_p2 }
  0x2f   :  { %p742_p5 = pnand %p741_p4, %p735_p1 }
  0xeb   :  { %v630_v5 = vpop.f32.mrf.mxu0 }
  0xec   :  { %v151_v9 = vadd.f32 %v630_v5, %v149_v6 }
  0xed   :  { %v140_v7 = vpop.f32.mrf.mxu0 }
  0xee   :  { %v150_v8 = vadd.f32 %v149_v6, %v140_v7 }
  0xf0   :  { %348 = vrot.lane.b32.xlu1 %v150_v8, %s789_s0  ;;  %153 = vrot.lane.b32.xlu0 %v150_v8, %s790_s2 }
  0xf4   :  { %424 = vrot.lane.b32.xlu1 %v151_v9, %s789_s0  ;;  %231 = vrot.lane.b32.xlu0 %v151_v9, %s790_s2 }
 0x162   :  { %v154_v10 = vpop.permute.xlu0 %153  ;;  %v349_v11 = vpop.permute.xlu1 %348 }
 0x163   :  { %632 = vmatpush3.xpose.msk.msra.mxu1 %vm155_vm2, %v154_v10 }
 0x164   :  { %641 = vmatprep.subr.mxu1 %v787_v4 }
 0x166   :  { %634 = vmatmul.mubr.msk.f32.vlgmr.msra.gmra.mxu1 %vm155_vm2, %v150_v8  ;;  %v232_v12 = vpop.permute.xlu0 %231  ;;  %v425_v13 = vpop.permute.xlu1 %424 }
 0x167   :  { %637 = vmatpush3.xpose.msk.msra.mxu0 %vm155_vm2, %v232_v12  ;;  %642 = vmatpush3.msra.mxu1 %v349_v11 }
 0x168   :  { %646 = vmatprep.subr.mxu0 %v787_v4  ;;  %643 = vmatprep.mubr.msk.f32.mxu1 %vm788_vm1, %v787_v4 }
 0x16a   :  { %639 = vmatmul.mubr.msk.f32.vlgmr.msra.gmra.mxu0 %vm155_vm2, %v151_v9 }
 0x16b   :  { %647 = vmatpush3.msra.mxu0 %v425_v13  ;;  %648 = vmatprep.mubr.msk.f32.mxu0 %vm788_vm1, %v787_v4 }
 0x226   :  { %v226_v14 = vpop.f32.mrf.mxu1 }
 0x227   :  { %v308_v15 = vsel %vm307_vm3, %v226_v14, -inf }
 0x228   :  { %v309_v16 = vrot.slane %v308_v15, 4  ;;  %v635_v17 = vpop.f32.mrf.mxu1 }
 0x22a   :  { %v310_v18 = vmax.f32 %v308_v15, %v309_v16  ;;  %v303_v19 = vpop.f32.mrf.mxu0 }
 0x22b   :  { %v315_v20 = vsel %vm307_vm3, %v303_v19, -inf }
 0x22c   :  { %v311_v21 = vrot.slane %v310_v18, 2  ;;  %v316_v22 = vrot.slane %v315_v20, 4  ;;  %v640_v23 = vpop.f32.mrf.mxu0 }
 0x22e   :  { %v312_v24 = vmax.f32 %v310_v18, %v311_v21  ;;  %v317_v25 = vmax.f32 %v315_v20, %v316_v22 }
 0x230   :  { %v313_v26 = vrot.slane %v312_v24, 1  ;;  %v318_v27 = vrot.slane %v317_v25, 2 }
 0x232   :  { %v314_v28 = vmax.f32 %v312_v24, %v313_v26  ;;  %v319_v29 = vmax.f32 %v317_v25, %v318_v27 }
 0x234   :  { %v322_v30 = vsub.f32 %v226_v14, %v314_v28  ;;  %v320_v31 = vrot.slane %v319_v29, 1 }
 0x236   :  { %v324_v32 = vmul.f32 1.442695, %v322_v30  ;;  %v321_v33 = vmax.f32 %v319_v29, %v320_v31 }
 0x238   :  { %662 = vpow2.f32 %v324_v32  ;;  %v323_v34 = vsub.f32 %v303_v19, %v321_v33 }
 0x23a   :  { %v326_v35 = vmul.f32 1.442695, %v323_v34 }
 0x23c   :  { %664 = vpow2.f32 %v326_v35 }
 0x245   :  { %v663_v36 = vpop.eup %662 }
 0x246   :  { %v328_v37 = vsel %vm307_vm3, %v663_v36, 0.0 }
 0x247   :  { %v329_v38 = vrot.slane %v328_v37, 4 }
 0x249   :  { %v665_v39 = vpop.eup %664  ;;  %v330_v40 = vadd.f32 %v329_v38, %v328_v37 }
 0x24a   :  { %v335_v41 = vsel %vm307_vm3, %v665_v39, 0.0 }
 0x24b   :  { %v331_v42 = vrot.slane %v330_v40, 2  ;;  %v336_v43 = vrot.slane %v335_v41, 4 }
 0x24d   :  { %v332_v44 = vadd.f32 %v331_v42, %v330_v40  ;;  %v337_v45 = vadd.f32 %v336_v43, %v335_v41 }
 0x24f   :  { %v338_v46 = vrot.slane %v337_v45, 2  ;;  %v333_v47 = vrot.slane %v332_v44, 1 }
 0x251   :  { %v339_v48 = vadd.f32 %v338_v46, %v337_v45  ;;  %v334_v49 = vadd.f32 %v333_v47, %v332_v44 }
 0x253   :  { %666 = vrcp.f32 %v334_v49  ;;  %v340_v50 = vrot.slane %v339_v48, 1 }
 0x255   :  { %v341_v51 = vadd.f32 %v340_v50, %v339_v48 }
 0x257   :  { %668 = vrcp.f32 %v341_v51 }
 0x260   :  { %v667_v52 = vpop.eup %666 }
 0x261   :  { %v344_v53 = vmul.f32 0.17677669, %v667_v52 }
 0x263   :  { %v346_v54 = vmul.f32 %v663_v36, %v344_v53 }
 0x264   :  { %v669_v55 = vpop.eup %668 }
 0x265   :  { %644 = vmatmul.mubr.msk.f32.vlgmr.msra.gmra.mxu1 %vm307_vm3, %v346_v54  ;;  %v345_v56 = vmul.f32 0.17677669, %v669_v55 }
 0x267   :  { %v347_v57 = vmul.f32 %v665_v39, %v345_v56 }
 0x269   :  { %649 = vmatmul.mubr.msk.f32.vlgmr.msra.gmra.mxu0 %vm307_vm3, %v347_v57 }
 0x325   :  { %v420_v58 = vpop.f32.mrf.mxu1 }
 0x326   :  { %500 = vst.msk [vmem:[#allocation8] sm:$0xff] %vm155_vm2, %v420_v58  ;;  %v502_v59 = vsel %vm155_vm2, %v420_v58, 0.0 }
 0x327   :  { %503 = vadd.xlane.f32.xlu0 %v502_v59  ;;  %v645_v60 = vpop.f32.mrf.mxu1 }
 0x329   :  { %v496_v61 = vpop.f32.mrf.mxu0 }
 0x32a   :  { %501 = vst.msk [vmem:[#allocation8 + $0x8] sm:$0xff] %vm155_vm2, %v496_v61  ;;  %v505_v62 = vsel %vm155_vm2, %v496_v61, 0.0 }
 0x32b   :  { %506 = vadd.xlane.f32.xlu1 %v505_v62  ;;  %v650_v63 = vpop.f32.mrf.mxu0 }
 0x3b0   :  { %v504_v0 = vpop.xlane.xlu0 %503 }
 0x3b1   :  { %v509_v1 = vmul.f32 0.03125, %v504_v0 }
 0x3b3   :  { %v511_v2 = vsub.f32 %v420_v58, %v509_v1 }
 0x3b4   :  { %v507_v3 = vpop.xlane.xlu1 %506 }
 0x3b5   :  { %v510_v4 = vmul.f32 0.03125, %v507_v3  ;;  %v513_v5 = vmul.f32 %v511_v2, %v511_v2 }
 0x3b7   :  { %v512_v6 = vsub.f32 %v496_v61, %v510_v4  ;;  %v515_v7 = vsel %vm155_vm2, %v513_v5, 0.0 }
 0x3b8   :  { %516 = vadd.xlane.f32.xlu0 %v515_v7 }
 0x3b9   :  { %v514_v8 = vmul.f32 %v512_v6, %v512_v6 }
 0x3bb   :  { %v518_v9 = vsel %vm155_vm2, %v514_v8, 0.0 }
 0x3bc   :  { %519 = vadd.xlane.f32.xlu0 %v518_v9 }
 0x3bd   :  { %745 = shalt.err (!%p742_p5)
}
 0x3be   :  { %581 = dma.vmem_to_hbm [thread:$0]  %s576_s14, 256, %s885_s5, [#allocation4], %s784_s26, %s784_s26, %s785_s27   ;;  %vm565_vm4 = vcmask 1041409   ;;  %vm568_vm5 = vcmask 254976  }
 0x3bf   :  { %v610_v17 = vld [vmem:[%s883_s3] ss:$0 sm:$0xff]  ;;  %s792_s3 = smov [#allocation9]  }
 0x3c0   :  { %v611_v19 = vld [vmem:[%s884_s4] ss:$0 sm:$0xff]  ;;  %s588_s4 = sshll.u32 %s792_s3, 4  ;;  %s589_s4 = int_to_ptr.vmem [resolvable:$true] %s588_s4 }
 0x3c1   :  { %s754_s5 = scalar_lea.vmem %s589_s4, 32  ;;  %p759_p7 = scmp.lt.s32.totalorder %s589_s4, %s589_s4 }
 0x3c2   :  { %p755_p6 = scmp.ne.s32.totalorder %s589_s4, %s754_s5  ;;  %p760_p8 = scmp.lt.s32.totalorder %s754_s5, %s754_s5 }
 0x3c4   :  { %p761_p9 = por %p760_p8, %p759_p7 }
 0x3c6   :  { %p762_p10 = pnand %p761_p9, %p755_p6 }
 0x441   :  { %v517_v10 = vpop.xlane.xlu0 %516 }
 0x442   :  { %v521_v11 = vmul.f32 0.03125, %v517_v10 }
 0x444   :  { %v523_v12 = vadd.f32 1e-05, %v521_v11 }
 0x445   :  { %v520_v13 = vpop.xlane.xlu0 %519 }
 0x446   :  { %670 = vrsqrt.f32 %v523_v12  ;;  %v522_v14 = vmul.f32 0.03125, %v520_v13 }
 0x448   :  { %v524_v15 = vadd.f32 1e-05, %v522_v14 }
 0x44a   :  { %672 = vrsqrt.f32 %v524_v15 }
 0x453   :  { %v671_v16 = vpop.eup %670 }
 0x454   :  { %v527_v18 = vmul.f32 %v671_v16, %v511_v2 }
 0x456   :  { %v536_v20 = vmul.f32 %v610_v17, %v527_v18 }
 0x457   :  { %v673_v21 = vpop.eup %672 }
 0x458   :  { %v528_v22 = vmul.f32 %v673_v21, %v512_v6  ;;  %v545_v23 = vadd.f32 %v611_v19, %v536_v20 }
 0x45a   :  { %v537_v24 = vmul.f32 %v610_v17, %v528_v22  ;;  %v547_v25 = vsel %vm155_vm2, %v545_v23, 0.0 }
 0x45b   :  { %v548_v26 = vrot.slane %v547_v25, 4 }
 0x45c   :  { %v546_v27 = vadd.f32 %v611_v19, %v537_v24 }
 0x45d   :  { %v549_v28 = vadd.f32 %v548_v26, %v547_v25 }
 0x45e   :  { %v554_v29 = vsel %vm155_vm2, %v546_v27, 0.0 }
 0x45f   :  { %v550_v30 = vrot.slane %v549_v28, 2  ;;  %v555_v31 = vrot.slane %v554_v29, 4 }
 0x461   :  { %v551_v32 = vadd.f32 %v550_v30, %v549_v28  ;;  %v556_v33 = vadd.f32 %v555_v31, %v554_v29 }
 0x463   :  { %v552_v34 = vrot.slane %v551_v32, 1  ;;  %v557_v35 = vrot.slane %v556_v33, 2 }
 0x465   :  { %v558_v36 = vadd.f32 %v557_v35, %v556_v33  ;;  %v553_v37 = vadd.f32 %v552_v34, %v551_v32 }
 0x467   :  { %v559_v38 = vrot.slane %v558_v36, 1  ;;  %v561_v40 = vmul.f32 0.125, %v553_v37 }
 0x469   :  { %v560_v39 = vadd.f32 %v559_v38, %v558_v36 }
 0x46b   :  { %v562_v41 = vmul.f32 0.125, %v560_v39 }
 0x46d   :  { %v566_v42 = vsel %vm565_vm4, %v562_v41, %v561_v40 }
 0x46e   :  { %569 = vst.msk [vmem:[#allocation9] sm:$0x3] %vm568_vm5, %v566_v42 }
 0x46f   :  { %765 = shalt.err (!%p762_p10)
}
 0x470   :  { %591 = dma.vmem_to_hbm [thread:$0]  %s589_s4, 32, %s886_s6, [#allocation10]  }
 0x471   :  { %778 = dma.done.wait [#allocation4], 256  }
 0x472   :  { %779 = vsyncadd [#allocation4], 4294967040 }
 0x473   :  { %780 = dma.done.wait [#allocation10], 32  }
 0x474   :  { %781 = vsyncadd [#allocation10], 4294967264 }
 0x475   :  { %598 = vsyncpa [#allocation3], 1 }
 0x476   :  { %599 = vsyncpa [#allocation6], 1 }
 0x477   :  { %600 = vsyncpa [#allocation4], 1 }
 0x478   :  { %601 = vsyncpa [#allocation10], 1 }

</bundles_post_ra>
